<compile_context>
chip_gen: v7x
topology: tpu7x:2x2x1
jax: 0.10.0
libtpu: 0.0.40
codegen_flags: <defaults>
</compile_context>

<pallas_src>
import functools

import numpy as np
import jax
import jax.numpy as jnp
from jax.experimental import pallas as pl
from jax.experimental.pallas import tpu as pltpu


# ----------------------------- Pallas kernel -------------------------------

def _centered_fft2_kernel(wv_ref, g_ref, out_ref, *, bt, n, compute_dtype):
    """One batch tile of R[b] = G @ X[b] @ G (G symmetric).

    wv_ref : (2, bt, n, n)   packed (real, imag) input block, natural layout
    g_ref  : (3, n, n)       packed (Gr, Gi - Gr, Gi + Gr)
    out_ref: (2, n, bt*n)    packed (real, imag), column-stacked over batch:
                             out[p, r, b*n + c] = component_p of R[b][r, c]
    """
    g_r = g_ref[0].astype(compute_dtype)          # Re(G)
    g_d = g_ref[1].astype(compute_dtype)          # Im(G) - Re(G)
    g_s = g_ref[2].astype(compute_dtype)          # Im(G) + Re(G)

    def mm(a, b):
        return jnp.dot(a.astype(compute_dtype), b.astype(compute_dtype),
                       preferred_element_type=jnp.float32)

    # ---- stage 1: U[b] = X[b] @ G, batch folded into the MXU M dimension ---
    # (leading-dim merge only -> no data movement)
    xr = wv_ref[0].reshape(bt * n, n)
    xi = wv_ref[1].reshape(bt * n, n)
    # Gauss 3-multiply (right factor combinations precomputed on host).
    k1 = mm(xr + xi, g_r)
    k2 = mm(xr, g_d)
    k3 = mm(xi, g_s)
    ur = k1 - k3                                   # Re(U), (bt*n, n)
    ui = k1 + k2                                   # Im(U)

    # ---- relayout: row-stacked (bt*n, n) -> column-stacked (n, bt*n) -------
    # Pure block placement: sublane-aligned row slices + one lane-axis
    # concatenate. No per-batch XLU lane transpose, no minor-dim reshape.
    def colstack(m):
        return jnp.concatenate(
            [m[b * n:(b + 1) * n, :] for b in range(bt)], axis=1)

    ucr = colstack(ur)
    uci = colstack(ui)

    # ---- stage 2: R[b] = G @ U[b], batch folded into the lane (N) dim ------
    k1 = mm(g_r, ucr + uci)
    k2 = mm(g_d, ucr)
    k3 = mm(g_s, uci)
    out_ref[0] = k1 - k3                           # Re(R): lane-dense store
    out_ref[1] = k1 + k2                           # Im(R): lane-dense store


# --------------------------- constant construction --------------------------

def build_centered_dft(n):
    """Packed (3, n, n) float32 constants [Gr, Gi-Gr, Gi+Gr] with G = P W P,
    so that ifftshift(fft2(fftshift(X))) == G @ X @ G (even n only)."""
    if n % 2 != 0:
        # TODO(synk): odd point_num needs two folded matrices (fftshift and
        # ifftshift permutations differ for odd n); only even n is supported.
        raise ValueError("shift-folded centered DFT requires even n")
    k = np.arange(n)
    w = np.exp(-2j * np.pi * np.outer(k, k) / n)    # float64 for accuracy
    idx = (k + n // 2) % n
    g = w[np.ix_(idx, idx)]                         # G = P @ W @ P
    gr = np.real(g).astype(np.float32)
    gi = np.imag(g).astype(np.float32)
    return jnp.asarray(np.stack([gr, gi - gr, gi + gr], axis=0))


# ----------------------------- tiling heuristics ----------------------------

def _vmem_budget_bytes():
    """~80% of physical VMEM, capped at 104 MiB.
    v5e/v6e (128 MiB) -> ~104 MiB; v7x (64 MiB) -> ~51 MiB."""
    phys = 64 * 1024 * 1024                        # conservative fallback
    try:
        phys = int(pltpu.get_tpu_info().vmem_capacity_bytes)
    except Exception:
        pass
    return min(int(phys * 0.8), 104 * 1024 * 1024)


def _pick_batch_tile(b, n, vmem_budget):
    """Largest batch tile that (a) divides b, (b) fits the VMEM budget with
    double-buffered in/out blocks plus live f32 temporaries, (c) keeps the
    column-stacked output block lane-aligned (bt*n % 128 == 0) unless it
    spans the whole batch, and (d) keeps the folded M dimension <= 4096 so
    the unrolled relayout stays small."""
    elem = 4 * n * n                               # one (n, n) f32 plane
    # in block (2*bt planes, x2 buffers) + out block (same) + ~8 temporaries
    per_bt = (4 + 4 + 8) * elem
    const_bytes = 2 * 3 * elem                     # double-buffered constants
    bt_cap = max(1, min((vmem_budget - const_bytes) // per_bt,
                        max(1, 4096 // max(n, 1)), b))
    divisors = [d for d in range(1, b + 1) if b % d == 0]
    ok = [d for d in divisors
          if d <= bt_cap and (d == b or (d * n) % 128 == 0)]
    if not ok:
        # Degenerate (tiny budget / awkward n): take the whole batch.
        return b
    bt = max(ok)
    # v7x megacore: prefer >= 2 grid steps, but only if the folded MXU M
    # dimension stays >= 512 rows.
    if bt == b and b > 1:
        smaller = [d for d in ok if d < b]
        if smaller and max(smaller) * n >= 512:
            bt = max(smaller)
    return bt


# ----------------------------- wrapper ------------------------------------

def diffra_fourier_layer(waves, g_packed=None, *, batch_tile=None,
                         use_bf16=False):
    """waves: complex64 (B, N, N) -> complex64 (B, N, N)."""
    b, n, n2 = waves.shape
    assert n == n2, "spatial dims must be square"
    compute_dtype = jnp.bfloat16 if use_bf16 else jnp.float32

    if g_packed is None:
        g_packed = build_centered_dft(n)
    if use_bf16:
        g_packed = g_packed.astype(jnp.bfloat16)

    budget = _vmem_budget_bytes()
    bt = batch_tile if batch_tile is not None else _pick_batch_tile(b, n, budget)
    assert b % bt == 0
    grid = (b // bt,)

    # Pack real/imag into one array (single input DMA per grid step).
    # TODO(synk): a complex64 -> f32[..., 2] bitcast with in-kernel
    # de-interleave would avoid this extra HBM pass; kept explicit for
    # lowering robustness.
    store_dtype = jnp.bfloat16 if use_bf16 else jnp.float32
    wv = jnp.stack([jnp.real(waves), jnp.imag(waves)], axis=0).astype(store_dtype)

    in_specs = [
        pl.BlockSpec((2, bt, n, n), lambda i: (0, i, 0, 0)),
        # TODO(synk): for very large n on v7x, single-buffer this invariant
        # constant (pipeline_mode=pl.Buffered(1)) to halve its VMEM footprint.
        pl.BlockSpec((3, n, n), lambda i: (0, 0, 0)),
    ]
    out_spec = pl.BlockSpec((2, n, bt * n), lambda i: (0, 0, i))

    cost = pl.CostEstimate(
        flops=12 * b * n ** 3,                     # 6 real matmuls (Gauss)
        transcendentals=0,
        bytes_accessed=(wv.size * wv.dtype.itemsize
                        + 2 * b * n * n * 4
                        + g_packed.size * g_packed.dtype.itemsize),
    )

    out = pl.pallas_call(
        functools.partial(_centered_fft2_kernel, bt=bt, n=n,
                          compute_dtype=compute_dtype),
        out_shape=jax.ShapeDtypeStruct((2, n, b * n), jnp.float32),
        grid=grid,
        in_specs=in_specs,
        out_specs=out_spec,
        compiler_params=pltpu.CompilerParams(
            dimension_semantics=("parallel",),
            vmem_limit_bytes=int(budget)),
        cost_estimate=cost,
    )(wv, g_packed)

    # Un-stack the column-stacked kernel output; the complex reconstruction
    # and the batch-major permutation fuse into the one pass XLA already
    # needed for out[0] + 1j*out[1].
    cplx = (out[0] + 1j * out[1]).astype(jnp.complex64)        # (N, B*N)
    return jnp.transpose(cplx.reshape(n, b, n), (1, 0, 2))     # (B, N, N)


# ----------------------------- main ----------------------------------------

if __name__ == "__main__":
    B, N = 4, 16

    key = jax.random.PRNGKey(0)
    kr, ki = jax.random.split(key)
    waves = (jax.random.normal(kr, (B, N, N), dtype=jnp.float32)
             + 1j * jax.random.normal(ki, (B, N, N), dtype=jnp.float32)
             ).astype(jnp.complex64)

    out = diffra_fourier_layer(waves)
    jax.block_until_ready(out)

    # Pure-JAX reference mirroring the PyTorch forward exactly.
    k_space = jnp.fft.fft2(jnp.fft.fftshift(waves, axes=(1, 2)), axes=(1, 2))
    ref = jnp.fft.ifftshift(k_space, axes=(1, 2))

    np.testing.assert_allclose(np.asarray(out), np.asarray(ref),
                               atol=2e-3, rtol=2e-3)
    print("KERNEL_OK")
</pallas_src>

<mosaic_0001>
module attributes {stable_mosaic.version = 11 : i64} {
  func.func @_centered_fft2_kernel(%arg0: i32, %arg1: memref<2x4x16x16xf32, #tpu.memory_space<vmem>>, %arg2: memref<3x16x16xf32, #tpu.memory_space<vmem>>, %arg3: memref<2x16x64xf32, #tpu.memory_space<vmem>>) attributes {dimension_semantics = [#tpu.dimension_semantics<parallel>], iteration_bounds = array<i64: 1>, scalar_prefetch = 0 : i64, scratch_operands = 0 : i64, tpu.core_type = #tpu.core_type<tc>, window_params = [{transform_indices = @transform_0, window_bounds = array<i64: 2, 4, 16, 16>}, {pipeline_mode = #tpu.pipeline_mode<synchronous>, transform_indices = @transform_1, window_bounds = array<i64: 3, 16, 16>}, {transform_indices = @transform_2, window_bounds = array<i64: 2, 16, 64>}]} {
    %c0 = arith.constant 0 : index
    %c0_0 = arith.constant 0 : index
    %c0_1 = arith.constant 0 : index
    %0 = vector.load %arg2[%c0, %c0_0, %c0_1] : memref<3x16x16xf32, #tpu.memory_space<vmem>>, vector<1x16x16xf32>
    %1 = vector.shape_cast %0 : vector<1x16x16xf32> to vector<16x16xf32>
    %c1 = arith.constant 1 : index
    %c0_2 = arith.constant 0 : index
    %c0_3 = arith.constant 0 : index
    %2 = vector.load %arg2[%c1, %c0_2, %c0_3] : memref<3x16x16xf32, #tpu.memory_space<vmem>>, vector<1x16x16xf32>
    %3 = vector.shape_cast %2 : vector<1x16x16xf32> to vector<16x16xf32>
    %c2 = arith.constant 2 : index
    %c0_4 = arith.constant 0 : index
    %c0_5 = arith.constant 0 : index
    %4 = vector.load %arg2[%c2, %c0_4, %c0_5] : memref<3x16x16xf32, #tpu.memory_space<vmem>>, vector<1x16x16xf32>
    %5 = vector.shape_cast %4 : vector<1x16x16xf32> to vector<16x16xf32>
    %c0_6 = arith.constant 0 : index
    %c0_7 = arith.constant 0 : index
    %c0_8 = arith.constant 0 : index
    %c0_9 = arith.constant 0 : index
    %6 = vector.load %arg1[%c0_6, %c0_7, %c0_8, %c0_9] : memref<2x4x16x16xf32, #tpu.memory_space<vmem>>, vector<1x4x16x16xf32>
    %7 = vector.shape_cast %6 : vector<1x4x16x16xf32> to vector<4x16x16xf32>
    %8 = vector.shape_cast %7 : vector<4x16x16xf32> to vector<64x16xf32>
    %c1_10 = arith.constant 1 : index
    %c0_11 = arith.constant 0 : index
    %c0_12 = arith.constant 0 : index
    %c0_13 = arith.constant 0 : index
    %9 = vector.load %arg1[%c1_10, %c0_11, %c0_12, %c0_13] : memref<2x4x16x16xf32, #tpu.memory_space<vmem>>, vector<1x4x16x16xf32>
    %10 = vector.shape_cast %9 : vector<1x4x16x16xf32> to vector<4x16x16xf32>
    %11 = vector.shape_cast %10 : vector<4x16x16xf32> to vector<64x16xf32>
    %12 = arith.addf %8, %11 : vector<64x16xf32>
    %cst = arith.constant dense<0.000000e+00> : vector<64x16xf32>
    %13 = tpu.matmul %12, %1, %cst {dimension_numbers = #tpu.dot_dimension_numbers<[1], [0], [0], [1], [0, 0, 1, 1], [], []>} : vector<64x16xf32>, vector<16x16xf32>, vector<64x16xf32> -> vector<64x16xf32>
    %cst_14 = arith.constant dense<0.000000e+00> : vector<64x16xf32>
    %14 = tpu.matmul %8, %3, %cst_14 {dimension_numbers = #tpu.dot_dimension_numbers<[1], [0], [0], [1], [0, 0, 1, 1], [], []>} : vector<64x16xf32>, vector<16x16xf32>, vector<64x16xf32> -> vector<64x16xf32>
    %cst_15 = arith.constant dense<0.000000e+00> : vector<64x16xf32>
    %15 = tpu.matmul %11, %5, %cst_15 {dimension_numbers = #tpu.dot_dimension_numbers<[1], [0], [0], [1], [0, 0, 1, 1], [], []>} : vector<64x16xf32>, vector<16x16xf32>, vector<64x16xf32> -> vector<64x16xf32>
    %16 = arith.subf %13, %15 : vector<64x16xf32>
    %17 = arith.addf %13, %14 : vector<64x16xf32>
    %18 = vector.extract_strided_slice %16 {offsets = [0, 0], sizes = [16, 16], strides = [1, 1]} : vector<64x16xf32> to vector<16x16xf32>
    %19 = vector.extract_strided_slice %16 {offsets = [16, 0], sizes = [16, 16], strides = [1, 1]} : vector<64x16xf32> to vector<16x16xf32>
    %20 = vector.extract_strided_slice %16 {offsets = [32, 0], sizes = [16, 16], strides = [1, 1]} : vector<64x16xf32> to vector<16x16xf32>
    %21 = vector.extract_strided_slice %16 {offsets = [48, 0], sizes = [16, 16], strides = [1, 1]} : vector<64x16xf32> to vector<16x16xf32>
    %22 = tpu.concatenate %18, %19, %20, %21 in 1 : vector<16x16xf32>, vector<16x16xf32>, vector<16x16xf32>, vector<16x16xf32> -> vector<16x64xf32>
    %23 = vector.extract_strided_slice %17 {offsets = [0, 0], sizes = [16, 16], strides = [1, 1]} : vector<64x16xf32> to vector<16x16xf32>
    %24 = vector.extract_strided_slice %17 {offsets = [16, 0], sizes = [16, 16], strides = [1, 1]} : vector<64x16xf32> to vector<16x16xf32>
    %25 = vector.extract_strided_slice %17 {offsets = [32, 0], sizes = [16, 16], strides = [1, 1]} : vector<64x16xf32> to vector<16x16xf32>
    %26 = vector.extract_strided_slice %17 {offsets = [48, 0], sizes = [16, 16], strides = [1, 1]} : vector<64x16xf32> to vector<16x16xf32>
    %27 = tpu.concatenate %23, %24, %25, %26 in 1 : vector<16x16xf32>, vector<16x16xf32>, vector<16x16xf32>, vector<16x16xf32> -> vector<16x64xf32>
    %28 = arith.addf %22, %27 : vector<16x64xf32>
    %cst_16 = arith.constant dense<0.000000e+00> : vector<16x64xf32>
    %29 = tpu.matmul %1, %28, %cst_16 {dimension_numbers = #tpu.dot_dimension_numbers<[1], [0], [0], [1], [0, 0, 1, 1], [], []>} : vector<16x16xf32>, vector<16x64xf32>, vector<16x64xf32> -> vector<16x64xf32>
    %cst_17 = arith.constant dense<0.000000e+00> : vector<16x64xf32>
    %30 = tpu.matmul %3, %22, %cst_17 {dimension_numbers = #tpu.dot_dimension_numbers<[1], [0], [0], [1], [0, 0, 1, 1], [], []>} : vector<16x16xf32>, vector<16x64xf32>, vector<16x64xf32> -> vector<16x64xf32>
    %cst_18 = arith.constant dense<0.000000e+00> : vector<16x64xf32>
    %31 = tpu.matmul %5, %27, %cst_18 {dimension_numbers = #tpu.dot_dimension_numbers<[1], [0], [0], [1], [0, 0, 1, 1], [], []>} : vector<16x16xf32>, vector<16x64xf32>, vector<16x64xf32> -> vector<16x64xf32>
    %32 = arith.subf %29, %31 : vector<16x64xf32>
    %c0_19 = arith.constant 0 : index
    %c0_20 = arith.constant 0 : index
    %c0_21 = arith.constant 0 : index
    %33 = vector.load %arg3[%c0_19, %c0_20, %c0_21] : memref<2x16x64xf32, #tpu.memory_space<vmem>>, vector<1x16x64xf32>
    %34 = vector.shape_cast %33 : vector<1x16x64xf32> to vector<16x64xf32>
    %35 = vector.shape_cast %32 : vector<16x64xf32> to vector<1x16x64xf32>
    tpu.vector_store %arg3[%c0_19, %c0_20, %c0_21], %35 {strides = array<i32>} : memref<2x16x64xf32, #tpu.memory_space<vmem>>, vector<1x16x64xf32>,
    %36 = arith.addf %29, %30 : vector<16x64xf32>
    %c1_22 = arith.constant 1 : index
    %c0_23 = arith.constant 0 : index
    %c0_24 = arith.constant 0 : index
    %37 = vector.load %arg3[%c1_22, %c0_23, %c0_24] : memref<2x16x64xf32, #tpu.memory_space<vmem>>, vector<1x16x64xf32>
    %38 = vector.shape_cast %37 : vector<1x16x64xf32> to vector<16x64xf32>
    %39 = vector.shape_cast %36 : vector<16x64xf32> to vector<1x16x64xf32>
    tpu.vector_store %arg3[%c1_22, %c0_23, %c0_24], %39 {strides = array<i32>} : memref<2x16x64xf32, #tpu.memory_space<vmem>>, vector<1x16x64xf32>,
    return
  }
  func.func @transform_0(%arg0: i32) -> (i32, i32, i32, i32) {
    %c0_i32 = arith.constant 0 : i32
    %c0_i32_0 = arith.constant 0 : i32
    %c0_i32_1 = arith.constant 0 : i32
    %c0_i32_2 = arith.constant 0 : i32
    return %c0_i32, %arg0, %c0_i32_0, %c0_i32_1 : i32, i32, i32, i32
  }
  func.func @transform_1(%arg0: i32) -> (i32, i32, i32) {
    %c0_i32 = arith.constant 0 : i32
    %c0_i32_0 = arith.constant 0 : i32
    %c0_i32_1 = arith.constant 0 : i32
    %c0_i32_2 = arith.constant 0 : i32
    return %c0_i32, %c0_i32_0, %c0_i32_1 : i32, i32, i32
  }
  func.func @transform_2(%arg0: i32) -> (i32, i32, i32) {
    %c0_i32 = arith.constant 0 : i32
    %c0_i32_0 = arith.constant 0 : i32
    %c0_i32_1 = arith.constant 0 : i32
    return %c0_i32, %c0_i32_0, %arg0 : i32, i32, i32
  }
}

</mosaic_0001>

<bundles_post_ra>
// kernel: tpu_custom_call.1
= control target key start
LH: loop header
LB: loop body
LE: loop exit
PB: predicated region body
PF: predicated region fallthrough
CT: control target
= control target key end

     0   :  { %7 = vsyncpa [#allocation3], 0  ;;  %s1201_s0 = inlined_call_operand.hbm [shape: f32[2,4,16,16], index: 0, kind: input, shape index: {}]   ;;  %s1202_s1 = inlined_call_operand.hbm [shape: f32[3,16,16], index: 1, kind: input, shape index: {}]   ;;  %s1203_s2 = inlined_call_operand.hbm [shape: f32[2,16,64], index: 2, kind: output, shape index: {}]  }
   0x1   :  { %8 = vsyncpa [#allocation6], 0 }
   0x2   :  { %9 = vsyncpa [#allocation4], 0  ;;  %s1057_s9 = smov [#allocation2]   ;;  %s985_s13 = scalar_lea.hbm %s1201_s0, 2048 }
   0x3   :  { %s15_s10 = sshll.u32 %s1057_s9, 4  ;;  %p986_p0 = scmp.ne.s32.totalorder %s1201_s0, %s985_s13  ;;  %s16_s10 = int_to_ptr.vmem [resolvable:$true] %s15_s10 }
   0x4   :  { %p989_p1 = scmp.lt.u32.totalorder %s985_s13, %s1201_s0 }
   0x6   :  { %p991_p2 = pnand %p989_p1, %p986_p0 }
   0x8   :  { %994 = shalt.err (!%p991_p2)
}
   0x9   :  { %s995_s18 = scalar_lea.vmem %s16_s10, 2048  ;;  %p1000_p4 = scmp.lt.s32.totalorder %s16_s10, %s16_s10 }
   0xa   :  { %p996_p3 = scmp.ne.s32.totalorder %s16_s10, %s995_s18  ;;  %p1001_p5 = scmp.lt.s32.totalorder %s995_s18, %s995_s18 }
   0xc   :  { %p1002_p6 = por %p1001_p5, %p1000_p4 }
   0xe   :  { %p1003_p7 = pnand %p1002_p6, %p996_p3 }
  0x10   :  { %1006 = shalt.err (!%p1003_p7)
}
  0x11   :  { %s1058_s19 = smov 128   ;;  %s1059_s20 = smov 8  }
  0x12   :  { %21 = dma.hbm_to_vmem [thread:$0]  %s1201_s0, 2048, %s16_s10, [#allocation3], %s1058_s19, %s1058_s19, %s1059_s20  }
  0x13   :  { %s1060_s23 = smov [#allocation5]   ;;  %s1007_s27 = scalar_lea.hbm %s1202_s1, 768 }
  0x14   :  { %s27_s24 = sshll.u32 %s1060_s23, 4  ;;  %p1008_p8 = scmp.ne.s32.totalorder %s1202_s1, %s1007_s27  ;;  %s28_s24 = int_to_ptr.vmem [resolvable:$true] %s27_s24 }
  0x15   :  { %p1011_p9 = scmp.lt.u32.totalorder %s1007_s27, %s1202_s1 }
  0x17   :  { %p1013_p10 = pnand %p1011_p9, %p1008_p8 }
  0x19   :  { %1016 = shalt.err (!%p1013_p10)
}
  0x1a   :  { %s1017_s4 = scalar_lea.vmem %s28_s24, 768  ;;  %p1022_p12 = scmp.lt.s32.totalorder %s28_s24, %s28_s24 }
  0x1b   :  { %p1018_p11 = scmp.ne.s32.totalorder %s28_s24, %s1017_s4  ;;  %p1023_p13 = scmp.lt.s32.totalorder %s1017_s4, %s1017_s4 }
  0x1d   :  { %p1024_p0 = por %p1023_p13, %p1022_p12 }
  0x1f   :  { %p1025_p1 = pnand %p1024_p0, %p1018_p11 }
  0x21   :  { %1028 = shalt.err (!%p1025_p1)
}
  0x22   :  { %33 = dma.hbm_to_vmem [thread:$0]  %s1202_s1, 768, %s28_s24, [#allocation6], %s1058_s19, %s1058_s19, %s1059_s20  }
  0x23   :  { %1051 = dma.done.wait [#allocation3], 2048  }
  0x24   :  { %1052 = vsyncadd [#allocation3], 4294965248 }
  0x25   :  { %1053 = dma.done.wait [#allocation6], 768  }
  0x26   :  { %1054 = vsyncadd [#allocation6], 4294966528  ;;  %vm73_vm0 = vcmask 130048   ;;  %v40_v0 = vld [vmem:[#allocation5] sm:$0xff]  ;;  %v1110_v1 = vld [vmem:[#allocation5 + $0x8] sm:$0xff]  ;;  %s1061_s1 = smov 16  }
  0x27   :  { %v1112_v2 = vld [vmem:[#allocation5 + $0x10] sm:$0xff]  ;;  %v953_v3 = vpack.c.bf16 %v1110_v1, %v40_v0  ;;  %v1115_v4 = vld [vmem:[#allocation5 + $0x18] sm:$0xff]  ;;  %v48_v5 = vld [vmem:[#allocation2] sm:$0xff]  ;;  %s1062_s6 = smov 32   ;;  %s1063_s7 = smov 48   ;;  %vm506_vm1 = vcmask 392192  }
  0x28   :  { %v57_v6 = vld [vmem:[#allocation2 + $0x40] sm:$0xff]  ;;  %v957_v7 = vpack.c.bf16 %v1115_v4, %v1112_v2  ;;  %904 = vmatprep.mubr.msk.f32.mxu1 %vm73_vm0, %v48_v5  ;;  %v49_v9 = vld [vmem:[#allocation2 + $0x8] sm:$0xff]  ;;  %v50_v11 = vld [vmem:[#allocation2 + $0x10] sm:$0xff]  ;;  %vm503_vm2 = vcmask 261120   ;;  %vm786_vm3 = vcmask 523264   ;;  %s1064_s8 = smov [#allocation7]  }
  0x29   :  { %v65_v8 = vadd.f32 %v57_v6, %v48_v5  ;;  %v58_v10 = vld [vmem:[#allocation2 + $0x48] sm:$0xff]  ;;  %954 = vmatprep.subr.bf16.mxu0 %v953_v3  ;;  %v59_v13 = vld [vmem:[#allocation2 + $0x50] sm:$0xff]  ;;  %v51_v15 = vld [vmem:[#allocation2 + $0x18] sm:$0xff]  ;;  %s799_s9 = sshll.u32 %s1064_s8, 4  ;;  %s800_s9 = int_to_ptr.vmem [resolvable:$true] %s799_s9 }
  0x2a   :  { %v66_v12 = vadd.f32 %v58_v10, %v49_v9  ;;  %958 = vmatprep.subr.bf16.mxu1 %v957_v7  ;;  %956 = vmatpush3.bf16.msra.mxu0 %v953_v3  ;;  %v67_v14 = vadd.f32 %v59_v13, %v50_v11  ;;  %v60_v16 = vld [vmem:[#allocation2 + $0x58] sm:$0xff]  ;;  %v52_v17 = vld [vmem:[#allocation2 + $0x20] sm:$0xff]  ;;  %v1124_v21 = vld [vmem:[#allocation5 + $0x28] sm:$0xff]  ;;  %s1029_s10 = scalar_lea.vmem %s800_s9, 512  ;;  %p1034_p3 = scmp.lt.s32.totalorder %s800_s9, %s800_s9 }
  0x2b   :  { %960 = vmatpush3.bf16.msra.mxu1 %v957_v7  ;;  %888 = vmatprep.mubr.msk.f32.mxu0 %vm73_vm0, %v65_v8  ;;  %v61_v18 = vld [vmem:[#allocation2 + $0x60] sm:$0xff]  ;;  %v68_v20 = vadd.f32 %v60_v16, %v51_v15  ;;  %v53_v23 = vld [vmem:[#allocation2 + $0x28] sm:$0xff]  ;;  %v54_v26 = vld [vmem:[#allocation2 + $0x30] sm:$0xff]  ;;  %p1030_p2 = scmp.ne.s32.totalorder %s800_s9, %s1029_s10  ;;  %p1035_p4 = scmp.lt.s32.totalorder %s1029_s10, %s1029_s10 }
  0x2c   :  { %v1121_v19 = vld [vmem:[#allocation5 + $0x20] sm:$0xff]  ;;  %v69_v22 = vadd.f32 %v61_v18, %v52_v17  ;;  %v62_v24 = vld [vmem:[#allocation2 + $0x68] sm:$0xff]  ;;  %v63_v27 = vld [vmem:[#allocation2 + $0x70] sm:$0xff] }
  0x2d   :  { %889 = vmatmul.mubr.msk.f32.vlgmr.msra.gmra.mrb[0].mxu0 %vm73_vm0, %v66_v12  ;;  %v961_v25 = vpack.c.bf16 %v1124_v21, %v1121_v19  ;;  %v70_v28 = vadd.f32 %v62_v24, %v53_v23  ;;  %v71_v29 = vadd.f32 %v63_v27, %v54_v26  ;;  %v55_v30 = vld [vmem:[#allocation2 + $0x38] sm:$0xff]  ;;  %p1036_p5 = por %p1035_p4, %p1034_p3 }
  0x2e   :  { %905 = vmatmul.mubr.msk.f32.vlgmr.msra.gmra.mrb[0].mxu1 %vm73_vm0, %v49_v9  ;;  %891 = vmatprep.mubr.msk.f32.mxu0 %vm73_vm0, %v67_v14  ;;  %v64_v31 = vld [vmem:[#allocation2 + $0x78] sm:$0xff] }
  0x2f   :  { %907 = vmatprep.mubr.msk.f32.mxu1 %vm73_vm0, %v50_v11  ;;  %962 = vmatprep.subr.bf16.mxu0 %v961_v25  ;;  %v72_v32 = vadd.f32 %v64_v31, %v55_v30  ;;  %p1037_p6 = pnand %p1036_p5, %p1030_p2 }
  0x30   :  { %964 = vmatpush3.bf16.msra.mxu0 %v961_v25 }
  0x31   :  { %892 = vmatmul.mubr.msk.f32.gmra.mrb[2].mxu0 %vm73_vm0, %v68_v20 }
  0x32   :  { %908 = vmatmul.mubr.msk.f32.gmra.mrb[2].mxu1 %vm73_vm0, %v51_v15  ;;  %894 = vmatprep.mubr.msk.f32.mxu0 %vm73_vm0, %v69_v22 }
  0x33   :  { %910 = vmatprep.mubr.msk.f32.mxu1 %vm73_vm0, %v52_v17 }
  0x35   :  { %895 = vmatmul.mubr.msk.f32.gmra.mrb[4].mxu0 %vm73_vm0, %v70_v28 }
  0x36   :  { %911 = vmatmul.mubr.msk.f32.gmra.mrb[4].mxu1 %vm73_vm0, %v53_v23  ;;  %897 = vmatprep.mubr.msk.f32.mxu0 %vm73_vm0, %v71_v29 }
  0x37   :  { %913 = vmatprep.mubr.msk.f32.mxu1 %vm73_vm0, %v54_v26 }
  0x39   :  { %898 = vmatmul.mubr.msk.f32.gmra.mrb[6].mxu0 %vm73_vm0, %v72_v32 }
  0x3a   :  { %914 = vmatmul.mubr.msk.f32.gmra.mrb[6].mxu1 %vm73_vm0, %v55_v30  ;;  %920 = vmatprep.mubr.msk.f32.mxu0 %vm73_vm0, %v57_v6 }
  0x3b   :  { %936 = vmatprep.mubr.msk.f32.mxu1 %vm73_vm0, %v40_v0 }
  0x3d   :  { %921 = vmatmul.mubr.msk.f32.vlgmr.msra.gmra.mrb[8].mxu0 %vm73_vm0, %v58_v10 }
  0x3e   :  { %923 = vmatprep.mubr.msk.f32.mxu0 %vm73_vm0, %v59_v13 }
  0x41   :  { %924 = vmatmul.mubr.msk.f32.gmra.mrb[10].mxu0 %vm73_vm0, %v60_v16 }
  0x42   :  { %926 = vmatprep.mubr.msk.f32.mxu0 %vm73_vm0, %v61_v18 }
  0x45   :  { %927 = vmatmul.mubr.msk.f32.gmra.mrb[12].mxu0 %vm73_vm0, %v62_v24 }
  0x46   :  { %929 = vmatprep.mubr.msk.f32.mxu0 %vm73_vm0, %v63_v27 }
  0x49   :  { %930 = vmatmul.mubr.msk.f32.gmra.mrb[14].mxu0 %vm73_vm0, %v64_v31 }
 0x100   :  { %v1150_v33 = vpop.f32.mrb[0].mxu0 }
 0x101   :  { %v906_v34 = vpop.f32.mrb[0].mxu1  ;;  %v1152_v35 = vpop.f32.mrb[1].mxu0 }
 0x102   :  { %v1155_v36 = vadd.f32 %v906_v34, %v1150_v33  ;;  %v293_v37 = vpop.f32.mrb[1].mxu1 }
 0x103   :  { %v1158_v38 = vadd.f32 %v293_v37, %v1152_v35 }
 0x104   :  { %v893_v39 = vpop.f32.mrb[2].mxu0 }
 0x105   :  { %v909_v40 = vpop.f32.mrb[2].mxu1  ;;  %v174_v41 = vpop.f32.mrb[3].mxu0 }
 0x106   :  { %v472_v42 = vadd.f32 %v909_v40, %v893_v39  ;;  %v303_v43 = vpop.f32.mrb[3].mxu1 }
 0x107   :  { %v471_v44 = vadd.f32 %v303_v43, %v174_v41 }
 0x108   :  { %513 = vrot.lane.b32.xlu1 %v472_v42, %s1061_s1  ;;  %v896_v45 = vpop.f32.mrb[4].mxu0 }
 0x109   :  { %v912_v46 = vpop.f32.mrb[4].mxu1  ;;  %v184_v47 = vpop.f32.mrb[5].mxu0 }
 0x10a   :  { %v474_v48 = vadd.f32 %v912_v46, %v896_v45  ;;  %v313_v49 = vpop.f32.mrb[5].mxu1 }
 0x10b   :  { %v473_v50 = vadd.f32 %v313_v49, %v184_v47 }
 0x10c   :  { %511 = vrot.lane.b32.xlu1 %v471_v44, %s1061_s1  ;;  %v899_v51 = vpop.f32.mrb[6].mxu0 }
 0x10d   :  { %v915_v52 = vpop.f32.mrb[6].mxu1  ;;  %519 = vrot.lane.b32.xlu0 %v473_v50, %s1062_s6  ;;  %v194_v53 = vpop.f32.mrb[7].mxu0 }
 0x10e   :  { %v476_v54 = vadd.f32 %v915_v52, %v899_v51  ;;  %v323_v55 = vpop.f32.mrb[7].mxu1 }
 0x10f   :  { %v475_v56 = vadd.f32 %v323_v55, %v194_v53 }
 0x110   :  { %521 = vrot.lane.b32.xlu1 %v474_v48, %s1062_s6  ;;  %v922_v57 = vpop.f32.mrb[8].mxu0 }
 0x111   :  { %v462_v58 = vsub.f32 %v1150_v33, %v922_v57  ;;  %v422_v59 = vpop.f32.mrb[9].mxu0 }
 0x112   :  { %v461_v60 = vsub.f32 %v1152_v35, %v422_v59 }
 0x114   :  { %v925_v61 = vpop.f32.mrb[10].mxu0 }
 0x115   :  { %v464_v62 = vsub.f32 %v893_v39, %v925_v61  ;;  %v432_v63 = vpop.f32.mrb[11].mxu0 }
 0x116   :  { %v463_v0 = vsub.f32 %v174_v41, %v432_v63 }
 0x117   :  { %481 = vrot.lane.b32.xlu0 %v464_v62, %s1061_s1 }
 0x118   :  { %v928_v3 = vpop.f32.mrb[12].mxu0 }
 0x119   :  { %v466_v5 = vsub.f32 %v896_v45, %v928_v3  ;;  %v442_v6 = vpop.f32.mrb[13].mxu0 }
 0x11a   :  { %v465_v7 = vsub.f32 %v184_v47, %v442_v6 }
 0x11b   :  { %479 = vrot.lane.b32.xlu0 %v463_v0, %s1061_s1  ;;  %489 = vrot.lane.b32.xlu1 %v466_v5, %s1062_s6 }
 0x11c   :  { %v931_v8 = vpop.f32.mrb[14].mxu0 }
 0x11d   :  { %v468_v9 = vsub.f32 %v899_v51, %v931_v8  ;;  %v452_v10 = vpop.f32.mrb[15].mxu0 }
 0x11e   :  { %v467_v11 = vsub.f32 %v194_v53, %v452_v10 }
 0x11f   :  { %487 = vrot.lane.b32.xlu0 %v465_v7, %s1062_s6  ;;  %497 = vrot.lane.b32.xlu1 %v468_v9, %s1063_s7 }
 0x123   :  { %529 = vrot.lane.b32.xlu1 %v476_v54, %s1063_s7  ;;  %495 = vrot.lane.b32.xlu0 %v467_v11, %s1063_s7 }
 0x127   :  { %527 = vrot.lane.b32.xlu0 %v475_v56, %s1063_s7 }
 0x17a   :  { %v514_v12 = vpop.permute.xlu1 %513 }
 0x17b   :  { %v534_v23 = vsel %vm73_vm0, %v1155_v36, %v514_v12 }
 0x17e   :  { %v512_v13 = vpop.permute.xlu1 %511 }
 0x17f   :  { %v520_v14 = vpop.permute.xlu0 %519  ;;  %v533_v31 = vsel %vm73_vm0, %v1158_v38, %v512_v13 }
 0x180   :  { %v535_v37 = vsel %vm503_vm2, %v533_v31, %v520_v14 }
 0x182   :  { %v522_v15 = vpop.permute.xlu1 %521 }
 0x183   :  { %v536_v26 = vsel %vm503_vm2, %v534_v23, %v522_v15 }
 0x189   :  { %v482_v16 = vpop.permute.xlu0 %481 }
 0x18a   :  { %v502_v24 = vsel %vm73_vm0, %v462_v58, %v482_v16 }
 0x18d   :  { %v480_v17 = vpop.permute.xlu0 %479  ;;  %v490_v18 = vpop.permute.xlu1 %489 }
 0x18e   :  { %v501_v25 = vsel %vm73_vm0, %v461_v60, %v480_v17  ;;  %v505_v27 = vsel %vm503_vm2, %v502_v24, %v490_v18 }
 0x191   :  { %v488_v20 = vpop.permute.xlu0 %487  ;;  %v498_v22 = vpop.permute.xlu1 %497 }
 0x192   :  { %v504_v28 = vsel %vm503_vm2, %v501_v25, %v488_v20  ;;  %v508_v32 = vsel %vm506_vm1, %v505_v27, %v498_v22 }
 0x195   :  { %v530_v29 = vpop.permute.xlu1 %529  ;;  %v496_v30 = vpop.permute.xlu0 %495 }
 0x196   :  { %v538_v33 = vsel %vm506_vm1, %v536_v26, %v530_v29  ;;  %v507_v34 = vsel %vm506_vm1, %v504_v28, %v496_v30 }
 0x197   :  { %v540_v35 = vadd.f32 %v538_v33, %v508_v32  ;;  %v969_v36 = vpack.c.bf16 %v508_v32, %v507_v34 }
 0x199   :  { %v528_v39 = vpop.permute.xlu0 %527 }
 0x19a   :  { %v537_v40 = vsel %vm506_vm1, %v535_v37, %v528_v39 }
 0x19b   :  { %v539_v41 = vadd.f32 %v537_v40, %v507_v34  ;;  %v973_v42 = vpack.c.bf16 %v538_v33, %v537_v40 }
 0x19d   :  { %v965_v43 = vpack.c.bf16 %v540_v35, %v539_v41 }
 0x19f   :  { %966 = vmatprep.subr.bf16.mxu1 %v965_v43 }
 0x1a0   :  { %968 = vmatpush3.bf16.msra.mxu1 %v965_v43 }
 0x1a1   :  { %970 = vmatprep.subr.bf16.mxu1 %v969_v36 }
 0x1a3   :  { %937 = vmatmul.mubr.msk.f32.vlgmr.msra.gmra.mrb[8].mxu1 %vm73_vm0, %v1110_v1 }
 0x1a4   :  { %972 = vmatpush3.bf16.msra.mxu1 %v969_v36  ;;  %943 = vmatprep.mubr.msk.f32.mxu1 %vm73_vm0, %v1112_v2 }
 0x1a5   :  { %974 = vmatprep.subr.bf16.mxu1 %v973_v42 }
 0x1a7   :  { %944 = vmatmul.mubr.msk.f32.vlgmr.msra.gmra.mrb[10].mxu1 %vm73_vm0, %v1115_v4 }
 0x1a8   :  { %976 = vmatpush3.bf16.msra.mxu1 %v973_v42  ;;  %950 = vmatprep.mubr.msk.f32.mxu1 %vm73_vm0, %v1121_v19 }
 0x1ab   :  { %951 = vmatmul.mubr.msk.f32.vlgmr.msra.gmra.mrb[12].mxu1 %vm73_vm0, %v1124_v21 }
 0x276   :  { %v938_v38 = vpop.f32.mrb[8].mxu1 }
 0x277   :  { %v613_v44 = vpop.f32.mrb[9].mxu1 }
 0x27a   :  { %v945_v45 = vpop.f32.mrb[10].mxu1 }
 0x27b   :  { %v790_v1 = vadd.f32 %v945_v45, %v938_v38  ;;  %v694_v46 = vpop.f32.mrb[11].mxu1 }
 0x27c   :  { %v789_v47 = vadd.f32 %v694_v46, %v613_v44 }
 0x27d   :  { %793 = vst.msk [vmem:[#allocation7 + $0x18] sm:$0xff] %vm786_vm3, %v790_v1 }
 0x27e   :  { %792 = vst.msk [vmem:[#allocation7 + $0x10] sm:$0xff] %vm786_vm3, %v789_v47  ;;  %v952_v2 = vpop.f32.mrb[12].mxu1 }
 0x27f   :  { %v785_v4 = vsub.f32 %v938_v38, %v952_v2  ;;  %v775_v48 = vpop.f32.mrb[13].mxu1 }
 0x280   :  { %v784_v49 = vsub.f32 %v613_v44, %v775_v48 }
 0x281   :  { %788 = vst.msk [vmem:[#allocation7 + $0x8] sm:$0xff] %vm786_vm3, %v785_v4 }
 0x282   :  { %787 = vst.msk [vmem:[#allocation7] sm:$0xff] %vm786_vm3, %v784_v49 }
 0x283   :  { %1040 = shalt.err (!%p1037_p6)
}
 0x284   :  { %s1041_s13 = scalar_lea.hbm %s1203_s2, 512 }
 0x285   :  { %p1042_p7 = scmp.ne.s32.totalorder %s1203_s2, %s1041_s13  ;;  %p1045_p8 = scmp.lt.u32.totalorder %s1041_s13, %s1203_s2 }
 0x287   :  { %p1047_p9 = pnand %p1045_p8, %p1042_p7 }
 0x289   :  { %1050 = shalt.err (!%p1047_p9)
}
 0x28a   :  { %805 = dma.vmem_to_hbm [thread:$0]  %s800_s9, 512, %s1203_s2, [#allocation4], %s1058_s19, %s1058_s19, %s1059_s20  }
 0x28b   :  { %1055 = dma.done.wait [#allocation4], 512  }
 0x28c   :  { %1056 = vsyncadd [#allocation4], 4294966784 }
 0x28d   :  { %809 = vsyncpa [#allocation3], 1 }
 0x28e   :  { %810 = vsyncpa [#allocation6], 1 }
 0x28f   :  { %811 = vsyncpa [#allocation4], 1 }

</bundles_post_ra>
